<compile_context>
chip_gen: v7x
topology: tpu7x:2x2x1
jax: 0.10.0
libtpu: 0.0.40
codegen_flags: <defaults>
</compile_context>

<pallas_src>
import functools
import math

import jax
import jax.numpy as jnp
import numpy as np
from jax.experimental import pallas as pl
from jax.experimental.pallas import tpu as pltpu


def _round_up(x, m):
    return ((x + m - 1) // m) * m


# ------------------------------ kernel ------------------------------------
def mha_kernel(mask_ref, xq_ref, xkv_ref, wqkv_ref, bqkv_ref, wo_ref, bo_ref,
               o_ref, acc_ref, *, head_dim_p):
    """One (batch, query-tile, head) grid step.

    mask_ref : (tq, T)   int8   -- 0 means "may not attend"
    xq_ref   : (tq, Ep)  bf16   -- query rows (lane-padded)
    xkv_ref  : (T,  Ep)  bf16   -- key/value rows (lane-padded)
    wqkv_ref : (Ep, 3*HDp) bf16 -- this head's [Wq|Wk|Wv], 1/sqrt(HD) folded into Wq
    bqkv_ref : (1, 3*HDp)  f32  -- this head's [bq|bk|bv] (bq pre-scaled)
    wo_ref   : (HDp, Ep)  bf16  -- this head's Wo rows
    bo_ref   : (1, Ep)    f32
    o_ref    : (tq, Ep)   f32
    acc_ref  : (tq, Ep)   f32 VMEM scratch (accumulates over the head axis)
    """
    HDp = head_dim_p
    h = pl.program_id(2)

    @pl.when(h == 0)
    def _init():
        acc_ref[...] = jnp.zeros_like(acc_ref)

    xq = xq_ref[...]                                        # (tq, Ep) bf16
    xkv = xkv_ref[...]                                      # (T,  Ep) bf16

    # Per-head projections: bf16 MXU operands, f32 accumulation.  All lane
    # slices below are at 128-aligned (HDp) boundaries -> whole-vreg views.
    q = (jnp.dot(xq, wqkv_ref[:, :HDp], preferred_element_type=jnp.float32)
         + bqkv_ref[:, :HDp])                               # (tq, HDp) f32, pre-scaled
    kv = (jnp.dot(xkv, wqkv_ref[:, HDp:], preferred_element_type=jnp.float32)
          + bqkv_ref[:, HDp:])                              # (T, 2*HDp) f32
    k = kv[:, :HDp]
    v = kv[:, HDp:]

    # Scores: q @ k^T without materializing a transpose (contract head dim),
    # bf16 operands, f32 accumulation.  Scale already folded into Wq/bq.
    s = jax.lax.dot_general(q.astype(jnp.bfloat16), k.astype(jnp.bfloat16),
                            (((1,), (1,)), ((), ())),
                            preferred_element_type=jnp.float32)   # (tq, T) f32
    s = jnp.where(mask_ref[...] != 0, s, -1e30)

    # Numerically stable softmax, all statistics in f32.  Exact reciprocal
    # (approx=False) per the correctness review.
    s = s - jnp.max(s, axis=-1, keepdims=True)
    p = jnp.exp(s)
    p = p * pl.reciprocal(jnp.sum(p, axis=-1, keepdims=True), approx=False)

    head = jnp.dot(p.astype(jnp.bfloat16), v.astype(jnp.bfloat16),
                   preferred_element_type=jnp.float32)            # (tq, HDp) f32

    # Accumulate this head directly through its Wo row block (K = HDp >= 128).
    acc_ref[...] += jnp.dot(head.astype(jnp.bfloat16), wo_ref[...],
                            preferred_element_type=jnp.float32)   # (tq, Ep) f32

    @pl.when(h == pl.num_programs(2) - 1)
    def _store():
        # Single lane-dense (tq, Ep) unmasked store.
        o_ref[...] = acc_ref[...] + bo_ref[...]


# ------------------------------ packing ------------------------------------
def _pack_params(params, embed_dim, num_heads):
    """Head-major, 128-lane-aligned weight slabs (bf16), f32 bias slabs.
    1/sqrt(head_dim) is folded into the Wq columns and bq."""
    E, H = embed_dim, num_heads
    HD = E // H
    HDp = _round_up(HD, 128)     # per-head lane padding -> aligned slices
    Ep = _round_up(E, 128)       # lane-dense activations / output
    scale = 1.0 / math.sqrt(HD)

    wq = np.asarray(params["wq"], np.float32)
    wk = np.asarray(params["wk"], np.float32)
    wv = np.asarray(params["wv"], np.float32)
    wo = np.asarray(params["wo"], np.float32)
    bq = np.asarray(params["bq"], np.float32).reshape(1, E)
    bk = np.asarray(params["bk"], np.float32).reshape(1, E)
    bv = np.asarray(params["bv"], np.float32).reshape(1, E)
    bo = np.asarray(params["bo"], np.float32).reshape(1, E)

    wqkv = np.zeros((Ep, H * 3 * HDp), np.float32)
    bqkv = np.zeros((1, H * 3 * HDp), np.float32)
    wo_s = np.zeros((H * HDp, Ep), np.float32)
    bo_s = np.zeros((1, Ep), np.float32)
    bo_s[:, :E] = bo

    for h in range(H):
        c = h * 3 * HDp
        hc = slice(h * HD, (h + 1) * HD)
        wqkv[:E, c:c + HD] = wq[:, hc] * scale              # Wq (scale folded)
        wqkv[:E, c + HDp:c + HDp + HD] = wk[:, hc]          # Wk
        wqkv[:E, c + 2 * HDp:c + 2 * HDp + HD] = wv[:, hc]  # Wv
        bqkv[:, c:c + HD] = bq[:, hc] * scale
        bqkv[:, c + HDp:c + HDp + HD] = bk[:, hc]
        bqkv[:, c + 2 * HDp:c + 2 * HDp + HD] = bv[:, hc]
        wo_s[h * HDp:h * HDp + HD, :E] = wo[hc, :]

    return (jnp.asarray(wqkv, jnp.bfloat16),
            jnp.asarray(bqkv, jnp.float32),
            jnp.asarray(wo_s, jnp.bfloat16),
            jnp.asarray(bo_s, jnp.float32),
            Ep, HDp)


# ------------------------------ wrapper ------------------------------------
def multi_head_attention(query, key, value, params, num_heads, attn_mask=None):
    """query: (N, S, E); key/value: (N, T, E) (key must be value).
    params: dict wq/wk/wv/wo (E, E) stored (in, out), bq/bk/bv/bo (1, E).
    attn_mask: (S, T); mask[i, j] == 0 means position j may not be attended."""
    assert key is value, "fused [Wk|Wv] projection requires key is value"
    N, S, E = query.shape
    T = key.shape[1]
    H = num_heads
    assert E % H == 0

    wqkv, bqkv, wo_s, bo_s, Ep, HDp = _pack_params(params, E, H)

    # Tiny int8 mask instead of an f32 additive mask (less DMA / VMEM).
    if attn_mask is None:
        mask = jnp.ones((S, T), jnp.int8)
    else:
        mask = (jnp.asarray(attn_mask) != 0).astype(jnp.int8)

    # Lane-pad activations to Ep and cast MXU operands to bf16 at the boundary.
    def pad_cast(x):
        if Ep != E:
            x = jnp.pad(x, ((0, 0), (0, 0), (0, Ep - E)))
        return x.astype(jnp.bfloat16)

    xq = pad_cast(query)
    xkv = pad_cast(key)

    # Query-tile axis: full sequence for small S, otherwise 128/256/512 tiles.
    tq = S
    for t in (512, 256, 128):
        if S > t and S % t == 0:
            tq = t
            break

    grid = (N, S // tq, H)   # batch, q-tile : parallel ; head : accumulation

    kern = functools.partial(mha_kernel, head_dim_p=HDp)
    out = pl.pallas_call(
        kern,
        out_shape=jax.ShapeDtypeStruct((N, S, Ep), jnp.float32),
        grid_spec=pltpu.PrefetchScalarGridSpec(
            num_scalar_prefetch=0,
            grid=grid,
            in_specs=[
                pl.BlockSpec((tq, T), lambda n, qi, h: (qi, 0)),            # int8 mask
                pl.BlockSpec((None, tq, Ep), lambda n, qi, h: (n, qi, 0)),  # query rows
                pl.BlockSpec((None, T, Ep), lambda n, qi, h: (n, 0, 0)),    # key/value rows
                pl.BlockSpec((Ep, 3 * HDp), lambda n, qi, h: (0, h)),       # [Wq|Wk|Wv] head h
                pl.BlockSpec((1, 3 * HDp), lambda n, qi, h: (0, h)),        # [bq|bk|bv] head h
                pl.BlockSpec((HDp, Ep), lambda n, qi, h: (h, 0)),           # Wo rows head h
                pl.BlockSpec((1, Ep), lambda n, qi, h: (0, 0)),             # bo
            ],
            out_specs=pl.BlockSpec((None, tq, Ep), lambda n, qi, h: (n, qi, 0)),
            scratch_shapes=[pltpu.VMEM((tq, Ep), jnp.float32)],
        ),
        compiler_params=pltpu.CompilerParams(
            dimension_semantics=("parallel", "parallel", "arbitrary")),
    )(mask, xq, xkv, wqkv, bqkv, wo_s, bo_s)

    return out[:, :, :E]


# ------------------------------ reference ----------------------------------
def reference(query, key, value, params, num_heads, attn_mask):
    N, S, E = query.shape
    T = key.shape[1]
    HD = E // num_heads
    q = query @ params["wq"] + params["bq"]
    k = key @ params["wk"] + params["bk"]
    v = value @ params["wv"] + params["bv"]
    qh = q.reshape(N, S, num_heads, HD).transpose(0, 2, 1, 3)
    kh = k.reshape(N, T, num_heads, HD).transpose(0, 2, 1, 3)
    vh = v.reshape(N, T, num_heads, HD).transpose(0, 2, 1, 3)
    s = jnp.einsum("nhsd,nhtd->nhst", qh, kh) / math.sqrt(HD)
    s = jnp.where(attn_mask[None, None] == 0, -1e30, s)
    p = jax.nn.softmax(s, axis=-1)
    o = jnp.einsum("nhst,nhtd->nhsd", p, vh).transpose(0, 2, 1, 3).reshape(N, S, E)
    return o @ params["wo"] + params["bo"]


# ------------------------------ demo / test ---------------------------------
if __name__ == "__main__":
    N, S, E, H = 2, 8, 32, 2

    key = jax.random.PRNGKey(0)
    ks = jax.random.split(key, 11)

    def lin_w(kk):
        return jax.random.normal(kk, (E, E), jnp.float32) / math.sqrt(E)

    def lin_b(kk):
        return jax.random.normal(kk, (1, E), jnp.float32) * 0.02

    params = {
        "wq": lin_w(ks[0]), "bq": lin_b(ks[1]),
        "wk": lin_w(ks[2]), "bk": lin_b(ks[3]),
        "wv": lin_w(ks[4]), "bv": lin_b(ks[5]),
        "wo": lin_w(ks[6]), "bo": lin_b(ks[7]),
    }
    x = jax.random.normal(ks[8], (N, S, E), jnp.float32)
    attn_mask = jnp.tril(jnp.ones((S, S), jnp.float32))   # causal mask

    # Self-attention.
    out = multi_head_attention(x, x, x, params, H, attn_mask)
    out = jax.block_until_ready(out)
    assert out.shape == (N, S, E)
    ref = reference(x, x, x, params, H, attn_mask)
    # Tolerance reflects bf16 MXU operands (f32 accumulation) vs. f32 reference.
    np.testing.assert_allclose(np.asarray(out), np.asarray(ref),
                               rtol=5e-2, atol=5e-2)

    # Cross-attention (query != key == value), exercising the second activation path.
    x2 = jax.random.normal(ks[9], (N, S, E), jnp.float32)
    out_x = multi_head_attention(x, x2, x2, params, H, attn_mask)
    out_x = jax.block_until_ready(out_x)
    ref_x = reference(x, x2, x2, params, H, attn_mask)
    np.testing.assert_allclose(np.asarray(out_x), np.asarray(ref_x),
                               rtol=5e-2, atol=5e-2)

    print("KERNEL_OK")
</pallas_src>

<mosaic_0001>
module attributes {stable_mosaic.version = 11 : i64} {
  func.func @mha_kernel(%arg0: i32, %arg1: i32, %arg2: i32, %arg3: memref<8x8xi8, #tpu.memory_space<vmem>>, %arg4: memref<1x8x128xbf16, #tpu.memory_space<vmem>>, %arg5: memref<1x8x128xbf16, #tpu.memory_space<vmem>>, %arg6: memref<128x384xbf16, #tpu.memory_space<vmem>>, %arg7: memref<1x384xf32, #tpu.memory_space<vmem>>, %arg8: memref<128x128xbf16, #tpu.memory_space<vmem>>, %arg9: memref<1x128xf32, #tpu.memory_space<vmem>>, %arg10: memref<1x8x128xf32, #tpu.memory_space<vmem>>, %arg11: memref<8x128xf32, #tpu.memory_space<vmem>>) attributes {dimension_semantics = [#tpu.dimension_semantics<parallel>, #tpu.dimension_semantics<parallel>, #tpu.dimension_semantics<arbitrary>], iteration_bounds = array<i64: 2, 1, 2>, scalar_prefetch = 0 : i64, scratch_operands = 1 : i64, tpu.core_type = #tpu.core_type<tc>, window_params = [{transform_indices = @transform_0, window_bounds = array<i64: 8, 8>}, {transform_indices = @transform_1, window_bounds = array<i64: 1, 8, 128>}, {transform_indices = @transform_2, window_bounds = array<i64: 1, 8, 128>}, {transform_indices = @transform_3, window_bounds = array<i64: 128, 384>}, {transform_indices = @transform_4, window_bounds = array<i64: 1, 384>}, {transform_indices = @transform_5, window_bounds = array<i64: 128, 128>}, {pipeline_mode = #tpu.pipeline_mode<synchronous>, transform_indices = @transform_6, window_bounds = array<i64: 1, 128>}, {transform_indices = @transform_7, window_bounds = array<i64: 1, 8, 128>}]} {
    %c0_i32 = arith.constant 0 : i32
    %0 = arith.cmpi eq, %arg2, %c0_i32 : i32
    %1 = arith.extui %0 : i1 to i32
    %c0_i32_0 = arith.constant 0 : i32
    %2 = arith.cmpi ne, %1, %c0_i32_0 : i32
    scf.if %2 {
      %cst_29 = arith.constant 0.000000e+00 : f32
      %49 = vector.broadcast %cst_29 : f32 to vector<8x128xf32>
      %c0_30 = arith.constant 0 : index
      %c0_31 = arith.constant 0 : index
      %50 = vector.load %arg11[%c0_30, %c0_31] : memref<8x128xf32, #tpu.memory_space<vmem>>, vector<8x128xf32>
      tpu.vector_store %arg11[%c0_30, %c0_31], %49 {strides = array<i32>} : memref<8x128xf32, #tpu.memory_space<vmem>>, vector<8x128xf32>,
    } else {
    }
    %c0 = arith.constant 0 : index
    %c0_1 = arith.constant 0 : index
    %c0_2 = arith.constant 0 : index
    %3 = vector.load %arg4[%c0, %c0_1, %c0_2] : memref<1x8x128xbf16, #tpu.memory_space<vmem>>, vector<1x8x128xbf16>
    %4 = vector.shape_cast %3 : vector<1x8x128xbf16> to vector<8x128xbf16>
    %c0_3 = arith.constant 0 : index
    %c0_4 = arith.constant 0 : index
    %c0_5 = arith.constant 0 : index
    %5 = vector.load %arg5[%c0_3, %c0_4, %c0_5] : memref<1x8x128xbf16, #tpu.memory_space<vmem>>, vector<1x8x128xbf16>
    %6 = vector.shape_cast %5 : vector<1x8x128xbf16> to vector<8x128xbf16>
    %c0_6 = arith.constant 0 : index
    %c0_7 = arith.constant 0 : index
    %7 = vector.load %arg6[%c0_6, %c0_7] : memref<128x384xbf16, #tpu.memory_space<vmem>>, vector<128x128xbf16>
    %cst = arith.constant dense<0.000000e+00> : vector<8x128xf32>
    %8 = tpu.matmul %4, %7, %cst {dimension_numbers = #tpu.dot_dimension_numbers<[1], [0], [0], [1], [0, 0, 1, 1], [], []>} : vector<8x128xbf16>, vector<128x128xbf16>, vector<8x128xf32> -> vector<8x128xf32>
    %c0_8 = arith.constant 0 : index
    %c0_9 = arith.constant 0 : index
    %9 = vector.load %arg7[%c0_8, %c0_9] : memref<1x384xf32, #tpu.memory_space<vmem>>, vector<1x128xf32>
    %10 = vector.broadcast %9 : vector<1x128xf32> to vector<8x128xf32>
    %11 = arith.addf %8, %10 : vector<8x128xf32>
    %c0_10 = arith.constant 0 : index
    %c128 = arith.constant 128 : index
    %12 = vector.load %arg6[%c0_10, %c128] : memref<128x384xbf16, #tpu.memory_space<vmem>>, vector<128x256xbf16>
    %cst_11 = arith.constant dense<0.000000e+00> : vector<8x256xf32>
    %13 = tpu.matmul %6, %12, %cst_11 {dimension_numbers = #tpu.dot_dimension_numbers<[1], [0], [0], [1], [0, 0, 1, 1], [], []>} : vector<8x128xbf16>, vector<128x256xbf16>, vector<8x256xf32> -> vector<8x256xf32>
    %c0_12 = arith.constant 0 : index
    %c128_13 = arith.constant 128 : index
    %14 = vector.load %arg7[%c0_12, %c128_13] : memref<1x384xf32, #tpu.memory_space<vmem>>, vector<1x256xf32>
    %15 = vector.broadcast %14 : vector<1x256xf32> to vector<8x256xf32>
    %16 = arith.addf %13, %15 : vector<8x256xf32>
    %17 = vector.extract_strided_slice %16 {offsets = [0, 0], sizes = [8, 128], strides = [1, 1]} : vector<8x256xf32> to vector<8x128xf32>
    %18 = vector.extract_strided_slice %16 {offsets = [0, 128], sizes = [8, 128], strides = [1, 1]} : vector<8x256xf32> to vector<8x128xf32>
    %19 = arith.truncf %11 : vector<8x128xf32> to vector<8x128xbf16>
    %20 = arith.truncf %17 : vector<8x128xf32> to vector<8x128xbf16>
    %cst_14 = arith.constant dense<0.000000e+00> : vector<8x8xf32>
    %21 = tpu.matmul %19, %20, %cst_14 {dimension_numbers = #tpu.dot_dimension_numbers<[1], [1], [0], [0], [0, 0, 1, 0], [], []>} : vector<8x128xbf16>, vector<8x128xbf16>, vector<8x8xf32> -> vector<8x8xf32>
    %c0_15 = arith.constant 0 : index
    %c0_16 = arith.constant 0 : index
    %22 = vector.load %arg3[%c0_15, %c0_16] : memref<8x8xi8, #tpu.memory_space<vmem>>, vector<8x8xi8>
    %c0_i8 = arith.constant 0 : i8
    %23 = vector.broadcast %c0_i8 : i8 to vector<8x8xi8>
    %24 = arith.cmpi ne, %22, %23 : vector<8x8xi8>
    %cst_17 = arith.constant -1.000000e+30 : f32
    %25 = vector.broadcast %cst_17 : f32 to vector<8x8xf32>
    %26 = arith.select %24, %21, %25 : vector<8x8xi1>, vector<8x8xf32>
    %cst_18 = arith.constant dense<0xFF800000> : vector<8xf32>
    %27 = vector.multi_reduction <maximumf>, %26, %cst_18 [1] : vector<8x8xf32> to vector<8xf32>
    %28 = vector.shape_cast %27 : vector<8xf32> to vector<8x1xf32>
    %29 = vector.broadcast %28 : vector<8x1xf32> to vector<8x8xf32>
    %30 = arith.subf %26, %29 : vector<8x8xf32>
    %31 = math.exp %30 : vector<8x8xf32>
    %cst_19 = arith.constant dense<0.000000e+00> : vector<8xf32>
    %32 = vector.multi_reduction <add>, %31, %cst_19 [1] : vector<8x8xf32> to vector<8xf32>
    %33 = vector.shape_cast %32 : vector<8xf32> to vector<8x1xf32>
    %34 = tpu.reciprocal %33 : vector<8x1xf32> -> vector<8x1xf32>
    %35 = vector.broadcast %34 : vector<8x1xf32> to vector<8x8xf32>
    %36 = arith.mulf %31, %35 : vector<8x8xf32>
    %37 = arith.truncf %36 : vector<8x8xf32> to vector<8x8xbf16>
    %38 = arith.truncf %18 : vector<8x128xf32> to vector<8x128xbf16>
    %cst_20 = arith.constant dense<0.000000e+00> : vector<8x128xf32>
    %39 = tpu.matmul %37, %38, %cst_20 {dimension_numbers = #tpu.dot_dimension_numbers<[1], [0], [0], [1], [0, 0, 1, 1], [], []>} : vector<8x8xbf16>, vector<8x128xbf16>, vector<8x128xf32> -> vector<8x128xf32>
    %c0_21 = arith.constant 0 : index
    %c0_22 = arith.constant 0 : index
    %40 = vector.load %arg11[%c0_21, %c0_22] : memref<8x128xf32, #tpu.memory_space<vmem>>, vector<8x128xf32>
    %41 = arith.truncf %39 : vector<8x128xf32> to vector<8x128xbf16>
    %c0_23 = arith.constant 0 : index
    %c0_24 = arith.constant 0 : index
    %42 = vector.load %arg8[%c0_23, %c0_24] : memref<128x128xbf16, #tpu.memory_space<vmem>>, vector<128x128xbf16>
    %cst_25 = arith.constant dense<0.000000e+00> : vector<8x128xf32>
    %43 = tpu.matmul %41, %42, %cst_25 {dimension_numbers = #tpu.dot_dimension_numbers<[1], [0], [0], [1], [0, 0, 1, 1], [], []>} : vector<8x128xbf16>, vector<128x128xbf16>, vector<8x128xf32> -> vector<8x128xf32>
    %44 = arith.addf %40, %43 : vector<8x128xf32>
    %c0_26 = arith.constant 0 : index
    %c0_27 = arith.constant 0 : index
    %45 = vector.load %arg11[%c0_26, %c0_27] : memref<8x128xf32, #tpu.memory_space<vmem>>, vector<8x128xf32>
    tpu.vector_store %arg11[%c0_26, %c0_27], %44 {strides = array<i32>} : memref<8x128xf32, #tpu.memory_space<vmem>>, vector<8x128xf32>,
    %c1_i32 = arith.constant 1 : i32
    %46 = arith.cmpi eq, %arg2, %c1_i32 : i32
    %47 = arith.extui %46 : i1 to i32
    %c0_i32_28 = arith.constant 0 : i32
    %48 = arith.cmpi ne, %47, %c0_i32_28 : i32
    scf.if %48 {
      %c0_29 = arith.constant 0 : index
      %c0_30 = arith.constant 0 : index
      %49 = vector.load %arg11[%c0_29, %c0_30] : memref<8x128xf32, #tpu.memory_space<vmem>>, vector<8x128xf32>
      %c0_31 = arith.constant 0 : index
      %c0_32 = arith.constant 0 : index
      %50 = vector.load %arg9[%c0_31, %c0_32] : memref<1x128xf32, #tpu.memory_space<vmem>>, vector<1x128xf32>
      %51 = vector.broadcast %50 : vector<1x128xf32> to vector<8x128xf32>
      %52 = arith.addf %49, %51 : vector<8x128xf32>
      %c0_33 = arith.constant 0 : index
      %c0_34 = arith.constant 0 : index
      %c0_35 = arith.constant 0 : index
      %53 = vector.load %arg10[%c0_33, %c0_34, %c0_35] : memref<1x8x128xf32, #tpu.memory_space<vmem>>, vector<1x8x128xf32>
      %54 = vector.shape_cast %53 : vector<1x8x128xf32> to vector<8x128xf32>
      %55 = vector.shape_cast %52 : vector<8x128xf32> to vector<1x8x128xf32>
      tpu.vector_store %arg10[%c0_33, %c0_34, %c0_35], %55 {strides = array<i32>} : memref<1x8x128xf32, #tpu.memory_space<vmem>>, vector<1x8x128xf32>,
    } else {
    }
    return
  }
  func.func @transform_0(%arg0: i32, %arg1: i32, %arg2: i32) -> (i32, i32) {
    %c0_i32 = arith.constant 0 : i32
    %c0_i32_0 = arith.constant 0 : i32
    return %arg1, %c0_i32 : i32, i32
  }
  func.func @transform_1(%arg0: i32, %arg1: i32, %arg2: i32) -> (i32, i32, i32) {
    %c0_i32 = arith.constant 0 : i32
    %c0_i32_0 = arith.constant 0 : i32
    return %arg0, %arg1, %c0_i32 : i32, i32, i32
  }
  func.func @transform_2(%arg0: i32, %arg1: i32, %arg2: i32) -> (i32, i32, i32) {
    %c0_i32 = arith.constant 0 : i32
    %c0_i32_0 = arith.constant 0 : i32
    %c0_i32_1 = arith.constant 0 : i32
    return %arg0, %c0_i32, %c0_i32_0 : i32, i32, i32
  }
  func.func @transform_3(%arg0: i32, %arg1: i32, %arg2: i32) -> (i32, i32) {
    %c0_i32 = arith.constant 0 : i32
    %c0_i32_0 = arith.constant 0 : i32
    return %c0_i32, %arg2 : i32, i32
  }
  func.func @transform_4(%arg0: i32, %arg1: i32, %arg2: i32) -> (i32, i32) {
    %c0_i32 = arith.constant 0 : i32
    %c0_i32_0 = arith.constant 0 : i32
    return %c0_i32, %arg2 : i32, i32
  }
  func.func @transform_5(%arg0: i32, %arg1: i32, %arg2: i32) -> (i32, i32) {
    %c0_i32 = arith.constant 0 : i32
    %c0_i32_0 = arith.constant 0 : i32
    return %arg2, %c0_i32 : i32, i32
  }
  func.func @transform_6(%arg0: i32, %arg1: i32, %arg2: i32) -> (i32, i32) {
    %c0_i32 = arith.constant 0 : i32
    %c0_i32_0 = arith.constant 0 : i32
    %c0_i32_1 = arith.constant 0 : i32
    return %c0_i32, %c0_i32_0 : i32, i32
  }
  func.func @transform_7(%arg0: i32, %arg1: i32, %arg2: i32) -> (i32, i32, i32) {
    %c0_i32 = arith.constant 0 : i32
    %c0_i32_0 = arith.constant 0 : i32
    return %arg0, %arg1, %c0_i32 : i32, i32, i32
  }
}

</mosaic_0001>

<bundles_post_ra>
// kernel: tpu_custom_call.1
= control target key start
LH: loop header
LB: loop body
LE: loop exit
PB: predicated region body
PF: predicated region fallthrough
CT: control target
= control target key end

     0   :  { %s2308_s0 = inlined_call_operand.hbm [shape: s8[8,8], index: 0, kind: input, shape index: {}]   ;;  %s2309_s1 = inlined_call_operand.hbm [shape: bf16[2,8,128], index: 1, kind: input, shape index: {}]   ;;  %s2310_s2 = inlined_call_operand.hbm [shape: bf16[2,8,128], index: 2, kind: input, shape index: {}]   ;;  %s2311_s3 = inlined_call_operand.hbm [shape: bf16[128,768], index: 3, kind: input, shape index: {}]   ;;  %s2312_s4 = inlined_call_operand.vmem [shape: f32[1,768], index: 4, kind: input, shape index: {}]   ;;  %s2313_s5 = inlined_call_operand.hbm [shape: bf16[256,128], index: 5, kind: input, shape index: {}]   ;;  %s2314_s6 = inlined_call_operand.vmem [shape: f32[1,128], index: 6, kind: input, shape index: {}]   ;;  %s2315_s7 = inlined_call_operand.hbm [shape: f32[2,8,128], index: 7, kind: output, shape index: {}]  }
   0x1   :  { %2335 = sst [smem:[#allocation25_spill]] %s2309_s1 }
   0x2   :  { %2336 = sst [smem:[#allocation26_spill]] %s2311_s3 }
   0x3   :  { %2337 = sst [smem:[#allocation27_spill]] %s2312_s4 }
   0x4   :  { %2338 = sst [smem:[#allocation28_spill]] %s2314_s6 }
   0x5   :  { %2339 = sst [smem:[#allocation29_spill]] %s2315_s7 }
   0x6   :  { %12 = vsyncpa [#allocation4], 0 }
   0x7   :  { %13 = vsyncpa [#allocation7], 0 }
   0x8   :  { %15 = vsyncpa [#allocation7 + $0x1], 0 }
   0x9   :  { %16 = vsyncpa [#allocation10], 0 }
   0xa   :  { %18 = vsyncpa [#allocation10 + $0x1], 0 }
   0xb   :  { %19 = vsyncpa [#allocation5], 0 }
   0xc   :  { %21 = vsyncpa [#allocation5 + $0x1], 0  ;;  %s1812_s24 = smov 0   ;;  %s1814_s25 = smov 0  }
   0xd   :  { %s1816_s26 = smov 0   ;;  %s1818_s27 = smov 0  }
   0xe   :  { %s1820_s28 = smov 0   ;;  %s1822_s29 = smov 0  }
   0xf   :  { %s1824_s30 = smov 0   ;;  %s1826_s8 = smov 0  }
  0x10   :  { %s1828_s9 = smov 0   ;;  %s1830_s10 = smov 0  }
  0x11   :  { %s1832_s11 = smov 0  }
  0x12 LB: > { %2340 = sst [smem:[#allocation17_spill]] %s1735_s29  ;;  %s39_s12 = sadd.s32 1, %s1747_s9  ;;  %s1755_s11 = sphi %s1832_s11, %s27_s11   ;;  %s1751_s10 = sphi %s1830_s10, %s2388_s10   ;;  %s1747_s9 = sphi %s1828_s9, %s2395_s9   ;;  %s1743_s8 = sphi %s1826_s8, %s2386_s8   ;;  %s1739_s30 = sphi %s1824_s30, %s2394_s30   ;;  %s1735_s29 = sphi %s1822_s29, %s2385_s29   ;;  %s1731_s28 = sphi %s1820_s28, %s2393_s28   ;;  %s1727_s27 = sphi %s1818_s27, %s2392_s27   ;;  %s1723_s26 = sphi %s1816_s26, %s2391_s26   ;;  %s1719_s25 = sphi %s1814_s25, %s2390_s25   ;;  %s1715_s24 = sphi %s1812_s24, %s2389_s24  }
  0x13   : > { %2341 = sst [smem:[#allocation18_spill]] %s1743_s8  ;;  %s46_s13 = sadd.s32 1, %s1751_s10 }
  0x14   : > { %2342 = sst [smem:[#allocation19_spill]] %s1751_s10  ;;  %p40_p0 = scmp.ge.s32.totalorder %s39_s12, 2 }
  0x15   : > { %s81_s14 = sadd.s32 1, %s1735_s29  ;;  %p2320_p1 = scmp.ne.s32.totalorder %s1735_s29, %s1731_s28 }
  0x16   : > { %p89_p2 = scmp.eq.s32.totalorder %s1755_s11, 0  ;;  %s2397_s12 = smov (%p40_p0, %s39_s12), 0 }
  0x17   : > { %2343 = sst [smem:[#allocation20_spill]] %s2397_s12  ;;  %s2399_s13 = smov (!%p40_p0, %s46_s13), %s1751_s10 }
  0x18   : > { %p1879_p3 = por %p89_p2, %p2320_p1  ;;  %s130_s16 = ssub.s32 %s1747_s9, %s2397_s12 }
  0x19   : > { %p48_p4 = scmp.ge.s32.totalorder %s2399_s13, 2  ;;  %p131_p5 = scmp.eq.s32.totalorder %s130_s16, 0 }
  0x1a   : > { %s133_s17 = sadd.s32 1, %s1723_s26  ;;  %p140_p6 = scmp.ne.s32.totalorder %s1723_s26, %s1719_s25 }
  0x1b   : > { %s2401_s13 = smov (%p48_p4, %s2399_s13), 0  ;;  %p2321_p9 = scmp.lt.s32.totalorder %s1755_s11, 4 }
  0x1c   : > { %2345 = sst [smem:[#allocation21_spill]] %s2401_s13  ;;  %s76_s19 = ssub.s32 %s1751_s10, %s2401_s13 }
  0x1d   : > { %s1891_s18 = scalar_select %p131_p5, %s1723_s26, %s133_s17  }
  0x1e   : > { %p1895_p7 = por %p140_p6, %p89_p2  ;;  %p79_p8 = scmp.eq.s32.totalorder %s76_s19, 0 }
  0x1f   : > { %2346 = sst [smem:[#allocation22_spill]] %s1891_s18  ;;  %s287_s21 = sand.u32 1, %s1755_s11  }
  0x20   : > { %s1902_s22 = scalar_select %p79_p8, %s1735_s29, %s81_s14  }
  0x21   : > { %s289_s23 = sand.u32 1, %s1735_s29   ;;  %s1164_s12 = sshll.u32 %s1751_s10, 6 }
  0x22   : > { %2348 = sst [smem:[#allocation23_spill]] %s1902_s22  ;;  %s1905_s16 = sshll.u32 %s289_s23, 2 }
  0x23   : > { %s2349_s1 = sld [smem:[#allocation25_spill]]  ;;  %s291_s13 = scalar_lea.vmem [#allocation6], %s1905_s16 }
  0x24   : > { %s299_s19 = sshll.u32 %s291_s13, 4  ;;  %p1918_p10 = pnand %p2321_p9, %p1879_p3  ;;  %s1922_s19 = int_to_ptr.vmem [resolvable:$true] %s299_s19 }
  0x25   : > { %s1927_s8 = scalar_lea.hbm %s2310_s2, %s1164_s12  ;;  %s1931_s10 = scalar_lea.sflag [#allocation7], %s287_s21 }
  0x26   : > { %p2322_p12 = pneg %p1918_p10 }
  0x29   : > { %s1911_s17 = scalar_lea.hbm %s2349_s1, %s1164_s12  ;;  %s1482_s18 = scalar_lea.hbm %s2349_s1, 128 }
  0x2a   : > { %s1477_s22 = scalar_lea.hbm %s1911_s17, 64  ;;  %p1483_p2 = scmp.lt.u32.totalorder %s1911_s17, %s2349_s1 }
  0x2b   : > { %p1478_p11 = scmp.ne.s32.totalorder %s1911_s17, %s1477_s22  ;;  %p1484_p3 = scmp.lt.u32.totalorder %s1482_s18, %s1477_s22 }
  0x2c   : > { %p1486_p5 = scmp.lt.u32.totalorder %s1477_s22, %s1911_s17 }
  0x2d   : > { %p1480_p13 = pnand %p2322_p12, %p1478_p11  ;;  %p1485_p4 = por %p1484_p3, %p1483_p2 }
  0x2f   : > { %p1481_p0 = pneg %p1480_p13  ;;  %p1487_p6 = por %p1486_p5, %p1485_p4 }
  0x31   : > { %p1488_p8 = pnand %p1487_p6, %p1481_p0 }
  0x33   : > { %1491 = shalt.err (!%p1488_p8)
}
  0x34   : > { %s1492_s12 = scalar_lea.vmem %s1922_s19, 64  ;;  %s1757_s23 = smov [#allocation6]  }
  0x35   : > { %p1493_p11 = scmp.ne.s32.totalorder %s1922_s19, %s1492_s12  ;;  %s1497_s7 = sshll.u32 %s1757_s23, 4  ;;  %s1498_s7 = int_to_ptr.vmem [resolvable:$false] %s1497_s7 }
  0x36   : > { %s1499_s4 = scalar_lea.vmem %s1498_s7, 128  ;;  %p1500_p9 = scmp.lt.s32.totalorder %s1922_s19, %s1498_s7 }
  0x37   : > { %p1495_p13 = pnand %p1493_p11, %p2322_p12  ;;  %p1501_p2 = scmp.lt.s32.totalorder %s1499_s4, %s1492_s12 }
  0x39   : > { %p1496_p1 = pneg %p1495_p13  ;;  %p1502_p3 = por %p1501_p2, %p1500_p9 }
  0x3b   : > { %p1503_p4 = pnand %p1502_p3, %p1496_p1 }
  0x3d   : > { %1506 = shalt.err (!%p1503_p4)
}
  0x3e   : > { %1317 = dma.hbm_to_vmem [thread:$0]  (!%p1918_p10), %s1911_s17, 64, %s1922_s19, %s1931_s10  }
  0x3f   : > { %p2351_p0 = scmp.lt.s32.totalorder %s1755_s11, 4  ;;  %s2326_s18 = sand.u32 1, %s1723_s26  }
  0x40   : > { %s1218_s22 = smul.u32 192, %s1747_s9  ;;  %s2353_s3 = sld [smem:[#allocation26_spill]] }
  0x41   : > { %p1963_p5 = pnand %p2351_p0, %p1895_p7  ;;  %s1294_s13 = smul.u32 192, %s2326_s18 }
  0x42   : > { %s1980_s19 = scalar_lea.sflag [#allocation10], %s287_s21 }
  0x43   : > { %s2352_s6 = scalar_select %p1963_p5, 1, 0 }
  0x44   : > { %s328_s20 = scalar_lea.vmem [#allocation9], %s1294_s13  ;;  %p2323_p7 = pneg %p1963_p5 }
  0x45   : > { %s335_s17 = sshll.u32 %s328_s20, 4  ;;  %s1976_s17 = int_to_ptr.vmem [resolvable:$true] %s335_s17 }
  0x46   : > { %s1974_s23 = scalar_lea.hbm %s2353_s3, %s1218_s22  ;;  %s1512_s15 = scalar_lea.hbm %s2353_s3, 6144 }
  0x47   : > { %s1507_s7 = scalar_lea.hbm %s1974_s23, 3072  ;;  %p1513_p8 = scmp.lt.u32.totalorder %s1974_s23, %s2353_s3 }
  0x48   : > { %p1508_p1 = scmp.ne.s32.totalorder %s1974_s23, %s1507_s7  ;;  %p1514_p11 = scmp.lt.u32.totalorder %s1512_s15, %s1507_s7 }
  0x49   : > { %p1516_p2 = scmp.lt.u32.totalorder %s1507_s7, %s1974_s23 }
  0x4a   : > { %p1510_p9 = pnand %p2323_p7, %p1508_p1  ;;  %p1515_p13 = por %p1514_p11, %p1513_p8 }
  0x4c   : > { %p1511_p6 = pneg %p1510_p9  ;;  %p1517_p3 = por %p1516_p2, %p1515_p13 }
  0x4e   : > { %p1518_p4 = pnand %p1517_p3, %p1511_p6 }
  0x50   : > { %1521 = shalt.err (!%p1518_p4)
}
  0x51   : > { %s1522_s21 = scalar_lea.vmem %s1976_s17, 3072  ;;  %s1758_s20 = smov [#allocation9]  }
  0x52   : > { %p1523_p0 = scmp.ne.s32.totalorder %s1976_s17, %s1522_s21  ;;  %s1527_s4 = sshll.u32 %s1758_s20, 4  ;;  %s1528_s4 = int_to_ptr.vmem [resolvable:$false] %s1527_s4 }
  0x53   : > { %s1529_s22 = scalar_lea.vmem %s1528_s4, 6144  ;;  %p1530_p12 = scmp.lt.s32.totalorder %s1976_s17, %s1528_s4 }
  0x54   : > { %p1525_p1 = pnand %p1523_p0, %p2323_p7  ;;  %p1531_p8 = scmp.lt.s32.totalorder %s1529_s22, %s1522_s21 }
  0x56   : > { %p1526_p9 = pneg %p1525_p1  ;;  %p1532_p11 = por %p1531_p8, %p1530_p12 }
  0x58   : > { %p1533_p13 = pnand %p1532_p11, %p1526_p9 }
  0x5a   : > { %1536 = shalt.err (!%p1533_p13)
}
  0x5b   : > { %s1759_s7 = smov 384   ;;  %s1760_s15 = smov 192  }
  0x5c   : > { %s1761_s12 = smov 12   ;;  %s2009_s13 = sadd.s32 4294967295, %s1755_s11  }
  0x5d   : > { %1323 = dma.hbm_to_vmem [thread:$0]  (!%p1963_p5), %s1974_s23, 3072, %s1976_s17, %s1980_s19, %s1759_s7, %s1760_s15, %s1761_s12  }
  0x5e   : > { %s1159_s21 = sadd.s32 4294967294, %s1755_s11   ;;  %p94_p12 = scmp.ne.s32.totalorder %s1731_s28, %s1727_s27 }
  0x5f   : > { %p2329_p6 = scmp.eq.s32.totalorder %s2009_s13, 0  ;;  %p146_p2 = scmp.ne.s32.totalorder %s1719_s25, %s1715_s24 }
  0x60   : > { %p245_p3 = scmp.eq.s32.totalorder %s2009_s13, 3  ;;  %p251_p4 = scmp.eq.s32.totalorder %s1159_s21, 3 }
  0x61   : > { %p2020_p0 = por %p2329_p6, %p94_p12  ;;  %p2026_p1 = por %p146_p2, %p2329_p6 }
  0x62   : > { %p2356_p9 = scmp.ne.s32.totalorder %s1735_s29, %s1731_s28  ;;  %p2037_p11 = por %p251_p4, %p94_p12 }
  0x63   : > { %s2354_s20 = scalar_select %p2020_p0, 1, 0 }
  0x64   : > { %s2355_s23 = scalar_select %p2026_p1, 1, 0 }
  0x65   : > { %p2033_p8 = por %p245_p3, %p2356_p9  ;;  %p1160_p13 = scmp.ge.s32.totalorder %s1755_s11, 1 }
  0x66   : > { %s2358_s24 = scalar_select %p2037_p11, 1, 0 }
  0x67   : > { %s2357_s17 = scalar_select %p2033_p8, 1, 0 }
  0x68   : > { %2359 = sst [smem:[#allocation24_spill]] %s2358_s24  ;;  %p258_p7 = scmp.lt.s32.totalorder %s1755_s11, 5 }
  0x69   : > { %s1762_s22 = smov [#allocation3]   ;;  %s310_s15 = scalar_lea.vmem [#allocation8], %s1905_s16 }
  0x6a   : > { %p2043_p5 = pnand %p1160_p13, %p258_p7  ;;  %s273_s7 = sshll.u32 %s1762_s22, 4  ;;  %s2047_s7 = int_to_ptr.vmem [resolvable:$true] %s273_s7 }
  0x6b   : > { %s317_s12 = sshll.u32 %s310_s15, 4  ;;  %s1537_s21 = scalar_lea.hbm %s1927_s8, 64  ;;  %s318_s12 = int_to_ptr.vmem [resolvable:$true] %s317_s12 }
  0x6c   : > { %s2360_s4 = scalar_select %p2043_p5, 1, 0 }
  0x6d   : > { %p1538_p2 = scmp.ne.s32.totalorder %s1927_s8, %s1537_s21  ;;  %p2361_p3 = pneg %p1918_p10 }
  0x6e   : > { %s1542_s3 = scalar_lea.hbm %s2310_s2, 128  ;;  %p1543_p9 = scmp.lt.u32.totalorder %s1927_s8, %s2310_s2 }
  0x6f   : > { %p1540_p4 = pnand %p1538_p2, %p2361_p3  ;;  %p1544_p13 = scmp.lt.u32.totalorder %s1542_s3, %s1537_s21 }
  0x70   : > { %p1546_p11 = scmp.lt.u32.totalorder %s1537_s21, %s1927_s8 }
  0x71   : > { %p1541_p7 = pneg %p1540_p4  ;;  %p1545_p6 = por %p1544_p13, %p1543_p9 }
  0x73   : > { %p1547_p8 = por %p1546_p11, %p1545_p6 }
  0x75   : > { %p1548_p12 = pnand %p1547_p8, %p1541_p7 }
  0x77   : > { %1551 = shalt.err (!%p1548_p12)
}
  0x78   : > { %s1552_s16 = scalar_lea.vmem %s318_s12, 64  ;;  %p2362_p2 = pmov %p2361_p3 }
  0x79   : > { %p1553_p1 = scmp.ne.s32.totalorder %s318_s12, %s1552_s16  ;;  %s1763_s22 = smov [#allocation8]  }
  0x7a   : > { %s1557_s1 = sshll.u32 %s1763_s22, 4  ;;  %s1558_s1 = int_to_ptr.vmem [resolvable:$false] %s1557_s1 }
  0x7b   : > { %p1555_p3 = pnand %p1553_p1, %p2362_p2  ;;  %s1559_s18 = scalar_lea.vmem %s1558_s1, 128 }
  0x7c   : > { %p1560_p0 = scmp.lt.s32.totalorder %s318_s12, %s1558_s1  ;;  %p1561_p5 = scmp.lt.s32.totalorder %s1559_s18, %s1552_s16 }
  0x7d   : > { %p1556_p4 = pneg %p1555_p3 }
  0x7e   : > { %p1562_p9 = por %p1561_p5, %p1560_p0 }
  0x80   : > { %p1563_p13 = pnand %p1562_p9, %p1556_p4 }
  0x82   : > { %1566 = shalt.err (!%p1563_p13)
}
  0x83   : > { %1320 = dma.hbm_to_vmem [thread:$0]  (!%p1918_p10), %s1927_s8, 64, %s318_s12, %s1931_s10  }
  0x84   : > { %p2363_p6 = scmp.eq.s32.totalorder %s2009_s13, 0  ;;  %p2364_p1 = scmp.ne.s32.totalorder %s2360_s4, 0 }
  0x85   : > { %s2367_s29 = sand.u32 1, %s1723_s26   ;;  %s1219_s15 = sshll.u32 %s1747_s9, 10 }
  0x86   : > { %p2365_p8 = pneg %p2364_p1  ;;  %s1168_s24 = sshll.u32 %s2367_s29, 6 }
  0x87   : > { %s2087_s16 = scalar_lea.hbm %s2313_s5, %s1219_s15  ;;  %s1567_s10 = scalar_lea.hbm %s2308_s0, 32 }
  0x88   : > { %p2077_p11 = pnand %p2365_p8, %p2363_p6  ;;  %p1568_p10 = scmp.ne.s32.totalorder %s2308_s0, %s1567_s10 }
  0x89   : > { %p1574_p7 = scmp.lt.u32.totalorder %s1567_s10, %s2308_s0 }
  0x8a   : > { %p1569_p5 = pneg %p2077_p11 }
  0x8c   : > { %p1570_p0 = pnand %p1569_p5, %p1568_p10 }
  0x8e   : > { %p1571_p12 = pneg %p1570_p0 }
  0x90   : > { %p1576_p2 = pnand %p1574_p7, %p1571_p12 }
  0x92   : > { %1579 = shalt.err (!%p1576_p2)
}
  0x93   : > { %s1580_s15 = scalar_lea.vmem %s2047_s7, 32  ;;  %p1588_p13 = scmp.lt.s32.totalorder %s2047_s7, %s2047_s7 }
  0x94   : > { %p1581_p3 = scmp.ne.s32.totalorder %s2047_s7, %s1580_s15  ;;  %p1589_p6 = scmp.lt.s32.totalorder %s1580_s15, %s1580_s15 }
  0x96   : > { %p1583_p4 = pnand %p1581_p3, %p1569_p5  ;;  %p1590_p8 = por %p1589_p6, %p1588_p13 }
  0x98   : > { %p1584_p9 = pneg %p1583_p4 }
  0x9a   : > { %p1591_p1 = pnand %p1590_p8, %p1584_p9 }
  0x9c   : > { %1594 = shalt.err (!%p1591_p1)
}
  0x9d   : > { %1313 = dma.hbm_to_vmem [thread:$0]  (!%p2077_p11), %s2308_s0, 32, %s2047_s7, [#allocation4]  }
  0x9e   : > { %s357_s22 = scalar_lea.vmem [#allocation11], %s1168_s24  ;;  %s1595_s10 = scalar_lea.hbm %s2087_s16, 1024 }
  0x9f   : > { %s364_s1 = sshll.u32 %s357_s22, 4  ;;  %p1596_p10 = scmp.ne.s32.totalorder %s2087_s16, %s1595_s10  ;;  %s2110_s1 = int_to_ptr.vmem [resolvable:$true] %s364_s1 }
  0xa0   : > { %p2368_p5 = scmp.ne.s32.totalorder %s2352_s6, 0  ;;  %s1600_s12 = scalar_lea.hbm %s2313_s5, 2048 }
  0xa1   : > { %p1601_p7 = scmp.lt.u32.totalorder %s2087_s16, %s2313_s5  ;;  %p1602_p2 = scmp.lt.u32.totalorder %s1600_s12, %s1595_s10 }
  0xa2   : > { %p2369_p1 = pneg %p2368_p5  ;;  %p1604_p3 = scmp.lt.u32.totalorder %s1595_s10, %s2087_s16 }
  0xa3   : > { %p1603_p11 = por %p1602_p2, %p1601_p7 }
  0xa4   : > { %p1598_p0 = pnand %p1596_p10, %p2369_p1 }
  0xa5   : > { %p1605_p4 = por %p1604_p3, %p1603_p11 }
  0xa6   : > { %p1599_p12 = pneg %p1598_p0 }
  0xa8   : > { %p1606_p9 = pnand %p1605_p4, %p1599_p12 }
  0xaa   : > { %1609 = shalt.err (!%p1606_p9)
}
  0xab   : > { %s1610_s7 = scalar_lea.vmem %s2110_s1, 1024  ;;  %p2370_p6 = pmov %p2369_p1 }
  0xac   : > { %p1611_p13 = scmp.ne.s32.totalorder %s2110_s1, %s1610_s7  ;;  %s1764_s24 = smov [#allocation11]  }
  0xad   : > { %s1615_s15 = sshll.u32 %s1764_s24, 4  ;;  %s1616_s15 = int_to_ptr.vmem [resolvable:$false] %s1615_s15 }
  0xae   : > { %p1613_p8 = pnand %p1611_p13, %p2370_p6  ;;  %s1617_s21 = scalar_lea.vmem %s1616_s15, 2048 }
  0xaf   : > { %p1618_p1 = scmp.lt.s32.totalorder %s2110_s1, %s1616_s15  ;;  %p1619_p0 = scmp.lt.s32.totalorder %s1617_s21, %s1610_s7 }
  0xb0   : > { %p1614_p10 = pneg %p1613_p8 }
  0xb1   : > { %p1620_p7 = por %p1619_p0, %p1618_p1 }
  0xb3   : > { %p1621_p2 = pnand %p1620_p7, %p1614_p10 }
  0xb5   : > { %1624 = shalt.err (!%p1621_p2)
}
  0xb6   : > { %s1765_s14 = smov 64   ;;  %s1766_s22 = smov 4  }
  0xb7   : > { %1326 = dma.hbm_to_vmem [thread:$0]  (!%p2368_p5), %s2087_s16, 1024, %s2110_s1, %s1980_s19, %s1765_s14, %s1765_s14, %s1766_s22  }
  0xb8   : > { %p2371_p12 = scmp.ne.s32.totalorder %s2360_s4, 0 }
  0xb9   : > { %p2372_p11 = scmp.eq.s32.totalorder (!%p2371_p12), %s2009_s13, 0 }
  0xba   : > { %376 = sbr.rel (%p2371_p12) target bundleno = 1468 (0x5bc), region = 48 }
  0xc1   : > { %1698 = dma.done.wait (%p2372_p11), [#allocation4], 32   ;;  %p2373_p3 = pmov %p2372_p11 }
  0xc2   : > { %s382_s10 = sand.u32 1, %s2009_s13   ;;  %s2144_s3 = sand.u32 1, %s1731_s28  }
  0xc3   : > { %1700 = vsyncadd (%p2373_p3), [#allocation4], 4294967264  ;;  %s1173_s8 = sshll.u32 %s2144_s3, 2  ;;  %s383_s12 = scalar_lea.sflag [#allocation7], %s382_s10 }
  0xc4   : > { %s2147_s6 = scalar_lea.vmem [#allocation6], %s1173_s8  ;;  %p2374_p5 = scmp.ne.s32.totalorder %s2354_s20, 0 }
  0xc6   : > { %1702 = dma.done.wait (%p2374_p5), %s383_s12, 128  }
  0xc7   : > { %1704 = vsyncadd (%p2374_p5), %s383_s12, 4294967168  ;;  %s402_s19 = sand.u32 1, %s1719_s25   ;;  %s2154_s16 = scalar_lea.vmem [#allocation8], %s1173_s8 }
  0xc8   : > { %s1295_s4 = smul.u32 192, %s402_s19  ;;  %s401_s1 = scalar_lea.sflag [#allocation10], %s382_s10 }
  0xc9   : > { %p2375_p4 = scmp.ne.s32.totalorder %s2355_s23, 0 }
  0xca   : > { %s2156_s13 = scalar_lea.vmem [#allocation9], %s1295_s4 }
  0xcb   : > { %1706 = dma.done.wait (%p2375_p4), %s401_s1, 4096  }
  0xcc   : > { %1708 = vsyncadd (%p2375_p4), %s401_s1, 4294963200  ;;  %s1175_s18 = sshll.u32 %s402_s19, 6  ;;  %s1176_s29 = sshll.u32 %s2144_s3, 3 }
  0xcd   : > { %s464_s20 = smul.u32 3, %s1739_s30  ;;  %s2376_s15 = sld [smem:[#allocation27_spill]] }
  0xce   : > { %s2169_s14 = scalar_lea.vmem [#allocation11], %s1175_s18  ;;  %s2171_s22 = scalar_lea.vmem [#allocation12], %s1176_s29 }
  0xcf   : > { %p465_p9 = scmp.lt.s32.totalorder %s464_s20, 5  ;;  %p1177_p13 = scmp.ne.s32.totalorder %s1739_s30, 0 }
  0xd0   : > { %v1767_v0 = vmov (!%p1177_p13), 0.0  }
  0xd1   : > { %s2403_s20 = smov (!%p465_p9, %s464_s20), 5  ;;  %476 = sbr.rel (%p1177_p13) target bundleno = 216 (0xd8), region = 72 }
  0xd2   : > { %477 = vst [vmem:[#allocation2] sm:$0xff] (!%p1177_p13), %v1767_v0 }
  0xd3   : > { %s2167_s21 = scalar_lea.vmem %s2376_s15, %s2403_s20 }
  0xd8 PF: > { %v1433_v1 = vld [vmem:[%s2156_s13 + $0x8] ss:$12 sps:$4 sm:$0xff]   ;;  %v1435_v2 = vld [vmem:[%s2156_s13 + $0x4] ss:$12 sps:$4 sm:$0xff]   ;;  %v1768_v3 = vmov 0.0   ;;  %v1769_v4 = vmov 0   ;;  %v609_v29 = vlaneseq }
  0xd9   : > { %1242 = vmatprep.subr.bf16.mxu0 %v1768_v3  ;;  %731 = vmatprep.mubr.bf16.mxu1 %v1769_v4  ;;  %v1436_v5 = vld [vmem:[%s2156_s13 + $0x20] ss:$12 sps:$4 sm:$0xff]   ;;  %v1438_v6 = vld [vmem:[%s2156_s13 + $0x1c] ss:$12 sps:$4 sm:$0xff]   ;;  %vm1770_vm0 = vmmov 0   ;;  %vm805_vm1 = vcmask 1043456  }
  0xda   : > { %699 = vmatprep.subr.bf16.mxu1 %v1433_v1  ;;  %1258 = vmatprep.mubr.msk.bf16.mxu0 %vm1770_vm0, %v1768_v3  ;;  %v1439_v7 = vld [vmem:[%s2156_s13] ss:$12 sps:$4 sm:$0xff]   ;;  %v1440_v8 = vld [vmem:[%s2156_s13 + $0x38] ss:$12 sps:$4 sm:$0xff]   ;;  %v1444_v11 = vld [vmem:[%s2156_s13 + $0x50] ss:$12 sps:$4 sm:$0xff]  }
  0xdb   : > { %700 = vmatpush1.bf16.msra.mxu1 %v1435_v2  ;;  %1243 = vmatpush3.bf16.msra.mxu0 %v1439_v7  ;;  %v1443_v9 = vld [vmem:[%s2156_s13 + $0x18] ss:$12 sps:$4 sm:$0xff]   ;;  %v1442_v10 = vld [vmem:[%s2156_s13 + $0x34] ss:$12 sps:$4 sm:$0xff]   ;;  %v1447_v12 = vld [vmem:[%s2156_s13 + $0x30] ss:$12 sps:$4 sm:$0xff]  }
  0xdc   : > { %701 = vmatprep.subr.bf16.mxu1 %v1436_v5  ;;  %1244 = vmatprep.subr.bf16.mxu0 %v1768_v3  ;;  %v1446_v13 = vld [vmem:[%s2156_s13 + $0x4c] ss:$12 sps:$4 sm:$0xff]   ;;  %v1448_v14 = vld [vmem:[%s2156_s13 + $0x68] ss:$12 sps:$4 sm:$0xff]   ;;  %v1450_v16 = vld [vmem:[%s2156_s13 + $0x64] ss:$12 sps:$4 sm:$0xff]  }
  0xdd   : > { %v1451_v15 = vld [vmem:[%s2156_s13 + $0x48] ss:$12 sps:$4 sm:$0xff]   ;;  %v1452_v17 = vld [vmem:[%s2156_s13 + $0x80] ss:$12 sps:$4 sm:$0xff]   ;;  %v1456_v20 = vld [vmem:[%s2156_s13 + $0x98] ss:$12 sps:$4 sm:$0xff]  }
  0xde   : > { %v1455_v18 = vld [vmem:[%s2156_s13 + $0x60] ss:$12 sps:$4 sm:$0xff]   ;;  %v1454_v19 = vld [vmem:[%s2156_s13 + $0x7c] ss:$12 sps:$4 sm:$0xff]   ;;  %v1459_v21 = vld [vmem:[%s2156_s13 + $0x78] ss:$12 sps:$4 sm:$0xff]  }
  0xdf   : > { %702 = vmatpush1.bf16.msra.mxu1 %v1438_v6  ;;  %1245 = vmatpush3.bf16.msra.mxu0 %v1443_v9  ;;  %v1458_v22 = vld [vmem:[%s2156_s13 + $0x94] ss:$12 sps:$4 sm:$0xff]   ;;  %v1460_v23 = vld [vmem:[%s2156_s13 + $0xb0] ss:$12 sps:$4 sm:$0xff]   ;;  %v1462_v25 = vld [vmem:[%s2156_s13 + $0xac] ss:$12 sps:$4 sm:$0xff]  }
  0xe0   : > { %703 = vmatprep.subr.bf16.mxu1 %v1440_v8  ;;  %1246 = vmatprep.subr.bf16.mxu0 %v1768_v3  ;;  %v1463_v24 = vld [vmem:[%s2156_s13 + $0x90] ss:$12 sps:$4 sm:$0xff]   ;;  %v1464_v26 = vld [vmem:[%s2156_s13 + $0xa8] ss:$12 sps:$4 sm:$0xff]   ;;  %v610_v30 = vshrl.u32 %v609_v29, 7  ;;  %vm788_vm4 = vcmask 64512  }
  0xe1   : > { %v479_v27 = vld [vmem:[%s2154_s16] sm:$0xf]  ;;  %v478_v28 = vld [vmem:[%s2147_s6] sm:$0xf]  ;;  %v782_v52 = vld [vmem:[#allocation3] sm:$0x3] }
  0xe2   : > { %v611_v31 = vsub.s32 0, %v610_v30  ;;  %v607_v32 = vld [vmem:[%s2167_s21 + $0x1] sm:$0x3]  ;;  %v615_v33 = vsub.s32 1, %v610_v30  ;;  %v1178_v39 = vld [vmem:[%s2167_s21] ss:$0 sm:$0xff]  ;;  %vm783_vm2 = vnez %v782_v52 }
  0xe3   : > { %704 = vmatpush1.bf16.msra.mxu1 %v1442_v10  ;;  %1247 = vmatpush3.bf16.msra.mxu0 %v1447_v12  ;;  %v784_v53 = vsel %vm783_vm2, 16843009, %v1769_v4  ;;  %v1465_v2 = vld [vmem:[%s2169_s14] sm:$0xff]   ;;  %v1466_v4 = vld [vmem:[%s2169_s14 + $0x8] sm:$0xff]   ;;  %v1467_v5 = vld [vmem:[%s2169_s14 + $0x10] sm:$0xff]   ;;  %p1212_p6 = scmp.ne.s32.totalorder %s1739_s30, 1 }
  0xe4   : > { %705 = vmatprep.subr.bf16.mxu1 %v1444_v11  ;;  %1248 = vmatprep.subr.bf16.mxu0 %v1768_v3  ;;  %v612_v34 = vrot.slane %v607_v32, %v611_v31  ;;  %v616_v36 = vrot.slane %v607_v32, %v615_v33  ;;  %v785_v54 = vunpack.c.0.s8 %v784_v53  ;;  %v1468_v6 = vld [vmem:[%s2169_s14 + $0x18] sm:$0xff]   ;;  %v1469_v7 = vld [vmem:[%s2169_s14 + $0x20] sm:$0xff]   ;;  %v1470_v8 = vld [vmem:[%s2169_s14 + $0x28] sm:$0xff]   ;;  %s2377_s8 = sld [smem:[#allocation28_spill]] (!%p1212_p6) }
  0xe5   : > { %v1471_v9 = vld [vmem:[%s2169_s14 + $0x30] sm:$0xff]  }
  0xe6   : > { %vm786_vm3 = vcmp.ne.s32.totalorder %v785_v54, 0 }
  0xe7   : > { %706 = vmatpush1.bf16.msra.mxu1 %v1446_v13  ;;  %1249 = vmatpush3.bf16.msra.mxu0 %v1451_v15 }
  0xe8   : > { %707 = vmatprep.subr.bf16.mxu1 %v1448_v14  ;;  %1250 = vmatprep.subr.bf16.mxu0 %v1768_v3  ;;  %v1472_v14 = vld [vmem:[%s2169_s14 + $0x38] sm:$0xff]  }
  0xeb   : > { %708 = vmatpush1.bf16.msra.mxu1 %v1450_v16  ;;  %1251 = vmatpush3.bf16.msra.mxu0 %v1455_v18 }
  0xec   : > { %709 = vmatprep.subr.bf16.mxu1 %v1452_v17  ;;  %1252 = vmatprep.subr.bf16.mxu0 %v1768_v3 }
  0xef   : > { %710 = vmatpush1.bf16.msra.mxu1 %v1454_v19  ;;  %1253 = vmatpush3.bf16.msra.mxu0 %v1459_v21 }
  0xf0   : > { %711 = vmatprep.subr.bf16.mxu1 %v1456_v20  ;;  %1254 = vmatprep.subr.bf16.mxu0 %v1768_v3  ;;  %v849_v20 = vld [vmem:[#allocation2] sm:$0xff] }
  0xf3   : > { %712 = vmatpush1.bf16.msra.mxu1 %v1458_v22  ;;  %1255 = vmatpush3.bf16.msra.mxu0 %v1463_v24 }
  0xf4   : > { %713 = vmatprep.subr.bf16.mxu1 %v1460_v23  ;;  %1256 = vmatprep.subr.bf16.mxu0 %v1768_v3 }
  0xf7   : > { %714 = vmatpush1.bf16.msra.mxu1 %v1462_v25  ;;  %1257 = vmatpush3.bf16.msra.mxu0 %v1464_v26  ;;  %v1213_v26 = vld [vmem:[%s2377_s8] ss:$0 sm:$0xff] (!%p1212_p6) }
  0xf8   : > { %1262 = vmatprep.subr.bf16.mxu1 %v1768_v3  ;;  %1274 = vmatprep.subr.bf16.mxu0 %v1768_v3 }
  0xfa   : > { %732 = vmatmul.mubr.bf16.vlgmr.msra.gmra.mrb[0].mxu1 %v479_v27  ;;  %1259 = vmatmul.mubr.bf16.vlgmr.msra.gmra.mrb[0].mxu0 %v478_v28 }
  0xfb   : > { %1264 = vmatprep.mubr.msk.bf16.mxu1 %vm1770_vm0, %v1768_v3  ;;  %1290 = vmatprep.mubr.msk.bf16.mxu0 %vm1770_vm0, %v1768_v3 }
  0xfc   : > { %1275 = vmatpush3.bf16.msra.mxu0 %v1465_v2 }
  0xfd   : > { %1276 = vmatprep.subr.bf16.mxu0 %v1768_v3 }
 0x100   : > { %1277 = vmatpush3.bf16.msra.mxu0 %v1466_v4 }
 0x101   : > { %1278 = vmatprep.subr.bf16.mxu0 %v1768_v3 }
 0x104   : > { %1279 = vmatpush3.bf16.msra.mxu0 %v1467_v5 }
 0x105   : > { %1280 = vmatprep.subr.bf16.mxu0 %v1768_v3 }
 0x108   : > { %1281 = vmatpush3.bf16.msra.mxu0 %v1468_v6 }
 0x109   : > { %1282 = vmatprep.subr.bf16.mxu0 %v1768_v3 }
 0x10c   : > { %1283 = vmatpush3.bf16.msra.mxu0 %v1469_v7 }
 0x10d   : > { %1284 = vmatprep.subr.bf16.mxu0 %v1768_v3 }
 0x110   : > { %1285 = vmatpush3.bf16.msra.mxu0 %v1470_v8 }
 0x111   : > { %1286 = vmatprep.subr.bf16.mxu0 %v1768_v3 }
 0x114   : > { %1287 = vmatpush3.bf16.msra.mxu0 %v1471_v9 }
 0x115   : > { %1288 = vmatprep.subr.bf16.mxu0 %v1768_v3 }
 0x118   : > { %1289 = vmatpush3.bf16.msra.mxu0 %v1472_v14 }
 0x1cd   : > { %v733_v35 = vpop.f32.mrb[0].mxu1  ;;  %v585_v41 = vpop.f32.mrb[0].mxu0 }
 0x1ce   : > { %v734_v37 = vadd.f32 %v733_v35, %v612_v34  ;;  %v735_v38 = vpop.f32.mrb[1].mxu1  ;;  %v1260_v44 = vpop.f32.mrb[1].mxu0  ;;  %v586_v46 = vadd.f32 %v1178_v39, %v585_v41 }
 0x1cf   : > { %v737_v40 = vpop.f32.mrb[2].mxu1  ;;  %v736_v45 = vadd.f32 %v735_v38, %v616_v36  ;;  %v588_v47 = vpop.f32.mrb[2].mxu0 }
 0x1d0   : > { %v741_v42 = vpack.c.bf16 %v734_v37, %v734_v37  ;;  %v738_v43 = vpop.f32.mrb[3].mxu1  ;;  %v1261_v48 = vpop.f32.mrb[3].mxu0  ;;  %v740_v50 = vpack.c.bf16 %v586_v46, %v586_v46 }
 0x1d1   : > { %v801_v49 = vpack.c.bf16 %v736_v45, %v736_v45 }
 0x1d2   : > { %1263 = vmatpush3.bf16.xpose.msra.mxu1 %v741_v42 }
 0x1d3   : > { %1268 = vmatprep.subr.bf16.mxu1 %v1768_v3  ;;  %v807_v51 = vsel %vm805_vm1, %v801_v49, 0 }
 0x1d9   : > { %1265 = vmatmul.mubr.bf16.vlgmr.msra.gmra.mrb[4].mxu1 %v740_v50 }
 0x1da   : > { %1269 = vmatpush3.bf16.msra.mxu1 %v807_v51  ;;  %1270 = vmatprep.mubr.msk.bf16.mxu1 %vm1770_vm0, %v1768_v3 }
 0x2ac   : > { %v776_v55 = vpop.f32.mrb[4].mxu1 }
 0x2ad   : > { %v787_v56 = vsel %vm786_vm3, %v776_v55, -1e+30  ;;  %v1266_v57 = vpop.f32.mrb[5].mxu1 }
 0x2ae   : > { %v779_v58 = vpop.f32.mrb[6].mxu1  ;;  %v789_v59 = vsel %vm788_vm4, %v787_v56, -inf }
 0x2af   : > { %790 = vmax.xlane.f32.xlu0 %v789_v59  ;;  %v1267_v60 = vpop.f32.mrb[7].mxu1 }
 0x33c   : > { %v791_v61 = vpop.xlane.xlu0 %790 }
 0x33d   : > { %v792_v62 = vsub.f32 %v787_v56, %v791_v61 }
 0x33f   : > { %v793_v63 = vmul.f32 1.442695, %v792_v62 }
 0x341   : > { %1473 = vpow2.f32 %v793_v63 }
 0x34b   : > { %v1474_v0 = vpop.eup %1473 }
 0x34c   : > { %v795_v1 = vsel %vm788_vm4, %v1474_v0, 0.0 }
 0x34d   : > { %796 = vadd.xlane.f32.xlu0 %v795_v1 }
 0x3da   : > { %v797_v10 = vpop.xlane.xlu0 %796 }
 0x3db   : > { %1475 = vrcp.f32 %v797_v10 }
 0x3e5   : > { %v1476_v11 = vpop.eup %1475 }
 0x3e6   : > { %v799_v12 = vmul.f32 %v1476_v11, %v1474_v0 }
 0x3e8   : > { %v800_v13 = vpack.c.bf16 %v799_v12, %v799_v12 }
 0x3ea   : > { %1271 = vmatmul.mubr.msk.bf16.vlgmr.msra.gmra.mrb[8].mxu1 %vm788_vm4, %v800_v13 }
 0x4bd   : > { %v843_v15 = vpop.f32.mrb[8].mxu1 }
 0x4be   : > { %v850_v16 = vpack.c.bf16 %v843_v15, %v843_v15  ;;  %v1272_v17 = vpop.f32.mrb[9].mxu1 }
 0x4bf   : > { %v846_v18 = vpop.f32.mrb[10].mxu1 }
 0x4c0   : > { %v1273_v19 = vpop.f32.mrb[11].mxu1  ;;  %1291 = vmatmul.mubr.bf16.vlgmr.msra.gmra.mrb[4].mxu0 %v850_v16 }
 0x590   : > { %960 = sbr.rel (%p1212_p6) target bundleno = 1441 (0x5a1), region = 76 }
 0x593   : > { %v949_v21 = vpop.f32.mrb[4].mxu0 }
 0x594   : > { %v955_v22 = vadd.f32 %v949_v21, %v849_v20  ;;  %v1292_v23 = vpop.f32.mrb[5].mxu0 }
 0x595   : > { %v952_v3 = vpop.f32.mrb[6].mxu0 }
 0x596   : > { %956 = vst [vmem:[#allocation2] sm:$0xff] %v955_v22  ;;  %v1293_v24 = vpop.f32.mrb[7].mxu0 }
 0x59d   : > { %v961_v25 = vld [vmem:[#allocation2] sm:$0xff] }
 0x59e   : > { %v969_v27 = vadd.f32 %v1213_v26, %v961_v25 }
 0x5a0   : > { %970 = vst [vmem:[%s2171_s22] sm:$0xff] %v969_v27 }
 0x5a1 PF: > { %s2378_s12 = sld [smem:[#allocation18_spill]]  ;;  %s2379_s16 = sld [smem:[#allocation29_spill]] }
 0x5a2   : > { %s986_s30 = sshll.u32 %s2171_s22, 4  ;;  %s972_s13 = scalar_lea.sflag [#allocation5], %s2144_s3  ;;  %s987_s30 = int_to_ptr.vmem [resolvable:$true] %s986_s30 }
 0x5a3   : > { %s1625_s18 = scalar_lea.vmem %s987_s30, 128  ;;  %p2380_p10 = scmp.ne.s32.totalorder %s2357_s17, 0 }
 0x5a4   : > { %p1626_p8 = scmp.ne.s32.totalorder %s987_s30, %s1625_s18  ;;  %s1771_s29 = smov [#allocation12]  }
 0x5a5   : > { %s1629_s20 = sshll.u32 %s1771_s29, 4  ;;  %s1630_s20 = int_to_ptr.vmem [resolvable:$false] %s1629_s20 }
 0x5a6   : > { %p1627_p1 = pnand %p1626_p8, %p2380_p10  ;;  %s1631_s7 = scalar_lea.vmem %s1630_s20, 256 }
 0x5a7   : > { %s1215_s6 = sshll.u32 %s2378_s12, 7  ;;  %p1632_p7 = scmp.lt.s32.totalorder %s987_s30, %s1630_s20 }
 0x5a8   : > { %s2250_s1 = scalar_lea.hbm %s2379_s16, %s1215_s6  ;;  %p1628_p0 = pneg %p1627_p1 }
 0x5a9   : > { %p1633_p2 = scmp.lt.s32.totalorder %s1631_s7, %s1625_s18 }
 0x5ab   : > { %p1634_p12 = por %p1633_p2, %p1632_p7 }
 0x5ad   : > { %p1635_p11 = pnand %p1634_p12, %p1628_p0 }
 0x5af   : > { %1638 = shalt.err (!%p1635_p11)
}
 0x5b0   : > { %s1639_s3 = scalar_lea.hbm %s2250_s1, 128  ;;  %s1643_s21 = scalar_lea.hbm %s2379_s16, 256 }
 0x5b1   : > { %p1640_p3 = scmp.ne.s32.totalorder %s2250_s1, %s1639_s3  ;;  %p1644_p9 = scmp.lt.u32.totalorder %s2250_s1, %s2379_s16 }
 0x5b2   : > { %p1645_p13 = scmp.lt.u32.totalorder %s1643_s21, %s1639_s3  ;;  %p1647_p8 = scmp.lt.u32.totalorder %s1639_s3, %s2250_s1 }
 0x5b3   : > { %p1641_p5 = pnand %p1640_p3, %p2380_p10 }
 0x5b4   : > { %p1646_p6 = por %p1645_p13, %p1644_p9 }
 0x5b5   : > { %p1642_p4 = pneg %p1641_p5 }
 0x5b6   : > { %p1648_p1 = por %p1647_p8, %p1646_p6 }
 0x5b8   : > { %p1649_p0 = pnand %p1648_p1, %p1642_p4 }
 0x5ba   : > { %1652 = shalt.err (!%p1649_p0)
}
 0x5bb   : > { %1308 = dma.vmem_to_hbm [thread:$0]  (%p2380_p10), %s987_s30, 128, %s2250_s1, %s972_s13  }
 0x5bc PF: > { %s2381_s23 = sld [smem:[#allocation24_spill]]  ;;  %p1334_p7 = scmp.ge.s32.totalorder %s1755_s11, 2 }
 0x5bd   : > { %s998_s10 = sand.u32 1, %s1727_s27  }
 0x5be   : > { %s999_s8 = scalar_lea.sflag [#allocation5], %s998_s10 }
 0x5c2   : > { %p2382_p2 = scmp.ne.s32.totalorder %s2381_s23, 0 }
 0x5c4   : > { %p1328_p12 = pnand %p1334_p7, %p2382_p2 }
 0x5c6   : > { %1710 = dma.done.wait (!%p1328_p12), %s999_s8, 128  }
 0x5c7   : > { %1712 = vsyncadd (!%p1328_p12), %s999_s8, 4294967168  ;;  %s27_s11 = sadd.s32 1, %s1755_s11   ;;  %s2383_s12 = sld [smem:[#allocation22_spill]] }
 0x5c8   : > { %p24_p11 = scmp.ge.s32.totalorder %s27_s11, 6   ;;  %s2384_s17 = sld [smem:[#allocation17_spill]] }
 0x5c9   : > { %s2385_s29 = sld [smem:[#allocation23_spill]]  ;;  %s2386_s8 = sld [smem:[#allocation19_spill]] }
 0x5ca   : > { %s2387_s6 = sld [smem:[#allocation20_spill]]  ;;  %s2388_s10 = sld [smem:[#allocation21_spill]] }
 0x5cb   : > { %s2389_s24 = smov %s1719_s25  ;;  %s2390_s25 = smov %s1723_s26 }
 0x5cc   : > { %s2392_s27 = smov %s1731_s28  ;;  %s2394_s30 = smov %s1747_s9 }
 0x5cd   : > { %s2391_s26 = smov %s2383_s12  ;;  %26 = sbr.rel (!%p24_p11) target bundleno = 18 (0x12), region = 145 }
 0x5ce   : > { %s2393_s28 = smov %s2384_s17 }
 0x5d0   : > { %s2395_s9 = smov %s2387_s6 }
 0x5d4   :  { %1004 = vsyncpa [#allocation4], 1 }
 0x5d5   :  { %1006 = vsyncpa [#allocation4 + $0x1], 1 }
 0x5d6   :  { %1007 = vsyncpa [#allocation7], 1 }
 0x5d7   :  { %1009 = vsyncpa [#allocation7 + $0x1], 1 }
 0x5d8   :  { %1010 = vsyncpa [#allocation10], 1 }
 0x5d9   :  { %1012 = vsyncpa [#allocation10 + $0x1], 1 }
 0x5da   :  { %1013 = vsyncpa [#allocation5], 1 }
 0x5db   :  { %1015 = vsyncpa [#allocation5 + $0x1], 1 }

</bundles_post_ra>
